<compile_context>
chip_gen: v7x
topology: tpu7x:2x2x1
jax: 0.10.0
libtpu: 0.0.40
codegen_flags: <defaults>
</compile_context>

<pallas_src>
import jax
import jax.numpy as jnp
from jax.experimental import pallas as pl
from jax.experimental.pallas import tpu as pltpu


BN_EPS = 1e-5  # PyTorch BatchNorm1d default


# --------------------------------------------------------------------------------------
# Kernel
# --------------------------------------------------------------------------------------
def mddnet_head_kernel(
    fmap_ref,            # (tb, S, C)  backbone feature-map tile, native dtype, C on lanes
    wb_ref, bb_ref,      # bottleneck Linear (BN + 1/S folded): (C, Bn) bf16, (1, Bn) f32
    w1_ref, b1_ref,      # fused classifier first layers: (Bn, 2W) bf16, (1, 2W) f32
    w2_ref, b2_ref,      # fused block-diag second layers: (2W, 2*NCp) bf16, (1, 2*NCp) f32
    feat_ref, out_ref, smax_ref, adv_ref,   # (tb, Bn), (tb, NCp), (tb, NCp), (tb, NCp)
):
    nc_pad = out_ref.shape[-1]

    # ---- ReLU + global-avg-pool (densenet branch of forward) --------------------------
    # ReLU in the fmap's native dtype (exact for max with 0); spatial sum reduced over
    # the sublane axis and accumulated in f32.  The 1/S mean scale is folded into wb.
    x = jnp.maximum(fmap_ref[...], 0)                       # (tb, S, C)   VPU
    sums = jnp.sum(x.astype(jnp.float32), axis=1)           # (tb, C)      XLU sublane reduce

    # ---- bottleneck: Linear (BN + 1/S folded) -> ReLU -> Dropout(identity in eval) ----
    z = jnp.dot(sums.astype(jnp.bfloat16), wb_ref[...],
                preferred_element_type=jnp.float32) + bb_ref[...]
    feats = jnp.maximum(z, 0.0)                              # (tb, Bn)
    feat_ref[...] = feats.astype(feat_ref.dtype)

    # ---- fused first layers of classifier_layer / classifier_layer_2 ------------------
    # (GRL / ReverseLayerF is identity in the forward pass, so both heads see `feats`.)
    h = jnp.dot(feats.astype(jnp.bfloat16), w1_ref[...],
                preferred_element_type=jnp.float32) + b1_ref[...]
    h = jnp.maximum(h, 0.0)                                  # (tb, 2W); Dropout identity

    # ---- fused second layers (block-diagonal): one MXU push for both heads ------------
    o2 = jnp.dot(h.astype(jnp.bfloat16), w2_ref[...],
                 preferred_element_type=jnp.float32) + b2_ref[...]   # (tb, 2*NCp)
    logits = o2[:, :nc_pad]                                  # padded lanes carry -1e30 bias
    adv = o2[:, nc_pad:]
    out_ref[...] = logits.astype(out_ref.dtype)
    adv_ref[...] = adv.astype(adv_ref.dtype)

    # ---- softmax(dim=1): padded-lane mask baked into b2 (-1e30 -> exp underflows to 0)
    m = jnp.max(logits, axis=-1, keepdims=True)
    e = jnp.exp(logits - m)
    denom = jnp.sum(e, axis=-1, keepdims=True)
    smax_ref[...] = (e * pl.reciprocal(denom, approx=True)).astype(smax_ref.dtype)


# --------------------------------------------------------------------------------------
# One-time (model-load) parameter preparation -- hoisted out of the per-call path.
# --------------------------------------------------------------------------------------
def prepare_params(params, spatial_size):
    bn_dim = params["wb"].shape[1]
    width = params["wc1"].shape[1]
    nc = params["wc2"].shape[1]
    nc_pad = ((nc + 127) // 128) * 128       # lane-dense class axis

    # Eval-mode BatchNorm1d and the 1/S GAP scale folded into the bottleneck Linear:
    #   z = ((sum_S relu(x)) / S) @ wb + bb ;  bn(z) = z*scale + (bb-rmean)*scale + beta
    scale = params["gamma"] * jax.lax.rsqrt(params["rvar"] + BN_EPS)             # (1, Bn)
    wb = (params["wb"] * scale / float(spatial_size)).astype(jnp.bfloat16)       # (C, Bn)
    bb = ((params["bb"] - params["rmean"]) * scale + params["beta"]).astype(jnp.float32)

    # Fuse the two classifiers' first layers along the output dim.
    w1 = jnp.concatenate([params["wc1"], params["wa1"]], axis=1).astype(jnp.bfloat16)  # (Bn, 2W)
    b1 = jnp.concatenate([params["bc1"], params["ba1"]], axis=1).astype(jnp.float32)   # (1, 2W)

    # Pad the class dim to nc_pad, build a block-diagonal fused second-layer weight, and
    # bake the softmax padded-lane mask into the classifier-head bias (-1e30).
    def pad_cols(w, fill=0.0):
        return jnp.pad(w, ((0, 0), (0, nc_pad - w.shape[1])), constant_values=fill)

    zeros = jnp.zeros((width, nc_pad), params["wc2"].dtype)
    w2 = jnp.concatenate(
        [jnp.concatenate([pad_cols(params["wc2"]), zeros], axis=1),
         jnp.concatenate([zeros, pad_cols(params["wa2"])], axis=1)],
        axis=0).astype(jnp.bfloat16)                                              # (2W, 2*NCp)
    b2 = jnp.concatenate([pad_cols(params["bc2"], -1e30),
                          pad_cols(params["ba2"], 0.0)], axis=1).astype(jnp.float32)

    return {"wb": wb, "bb": bb, "w1": w1, "b1": b1, "w2": w2, "b2": b2,
            "nc": int(nc), "nc_pad": int(nc_pad)}


# --------------------------------------------------------------------------------------
# Wrapper
# --------------------------------------------------------------------------------------
def _choose_batch_tile(batch, fmap_row_bytes):
    """Largest batch tile whose double-buffered fmap stream stays within a conservative
    cross-generation VMEM budget (v7x: 64 MiB total), keeping >= 2 grid steps so the
    "parallel" batch axis can feed both v7x TensorCores when the batch allows it."""
    budget = 24 << 20                                  # bytes for the fmap stream
    cap = max(1, budget // (2 * max(1, fmap_row_bytes)))
    tb = min(batch, cap)
    if tb >= batch and batch >= 16:
        tb = batch // 2                                # >= 2 grid steps
    while batch % tb:                                  # grid must tile the batch exactly
        tb -= 1
    return tb


def mddnet_forward(fmap_nhwc, prep):
    """fmap_nhwc: (B, H, W, C) backbone feature map (native dtype, NHWC / conv-native).
    prep: output of prepare_params()."""
    B, H, W, C = fmap_nhwc.shape
    S = H * W
    bn_dim = prep["wb"].shape[1]
    nc, nc_pad = prep["nc"], prep["nc_pad"]

    # Free reshape only -- no transpose, no standalone cast pass over the feature map.
    x = fmap_nhwc.reshape(B, S, C)

    tb = _choose_batch_tile(B, S * C * x.dtype.itemsize)
    grid = (B // tb,)

    # Estimated VMEM footprint (everything default double-buffered); raise the scoped
    # VMEM limit only when it would exceed the default.
    weight_bytes = sum(int(a.size) * a.dtype.itemsize
                       for a in (prep["wb"], prep["bb"], prep["w1"],
                                 prep["b1"], prep["w2"], prep["b2"]))
    fmap_tile_bytes = tb * S * C * x.dtype.itemsize
    out_tile_bytes = tb * (bn_dim + 3 * nc_pad) * 4
    vmem_est = 2 * (fmap_tile_bytes + weight_bytes + out_tile_bytes)
    vmem_limit = int(min(vmem_est * 1.25, 100 << 20)) if vmem_est > (24 << 20) else None

    def resident(arr):   # small weights: constant index_map -> stay VMEM-resident
        return pl.BlockSpec(arr.shape, lambda b: (0, 0))

    feats, out_p, smax_p, adv_p = pl.pallas_call(
        mddnet_head_kernel,
        out_shape=(
            jax.ShapeDtypeStruct((B, bn_dim), jnp.float32),   # features
            jax.ShapeDtypeStruct((B, nc_pad), jnp.float32),   # outputs (padded logits)
            jax.ShapeDtypeStruct((B, nc_pad), jnp.float32),   # softmax_outputs (padded)
            jax.ShapeDtypeStruct((B, nc_pad), jnp.float32),   # outputs_adv (padded)
        ),
        grid=grid,
        in_specs=[
            pl.BlockSpec((tb, S, C), lambda b: (b, 0, 0)),    # fmap tile (pipelined)
            resident(prep["wb"]), resident(prep["bb"]),
            resident(prep["w1"]), resident(prep["b1"]),
            resident(prep["w2"]), resident(prep["b2"]),
        ],
        out_specs=(
            pl.BlockSpec((tb, bn_dim), lambda b: (b, 0)),
            pl.BlockSpec((tb, nc_pad), lambda b: (b, 0)),
            pl.BlockSpec((tb, nc_pad), lambda b: (b, 0)),
            pl.BlockSpec((tb, nc_pad), lambda b: (b, 0)),
        ),
        compiler_params=pltpu.CompilerParams(
            dimension_semantics=("parallel",),
            vmem_limit_bytes=vmem_limit),
    )(x, prep["wb"], prep["bb"], prep["w1"], prep["b1"], prep["w2"], prep["b2"])

    # Slice the padded class lanes back to class_num.
    return feats, out_p[:, :nc], smax_p[:, :nc], adv_p[:, :nc]


# --------------------------------------------------------------------------------------
# Parameter init mirroring the PyTorch __init__ (weights stored as (in, out)).
# --------------------------------------------------------------------------------------
def init_params(key, width, bottleneck_dim, class_num):
    k = jax.random.split(key, 3)
    p = {}
    # bottleneck Linear: weight ~ N(0, 0.005), bias = 0.1
    p["wb"] = 0.005 * jax.random.normal(k[0], (width, bottleneck_dim), jnp.float32)
    p["bb"] = jnp.full((1, bottleneck_dim), 0.1, jnp.float32)
    # BatchNorm1d defaults
    p["gamma"] = jnp.ones((1, bottleneck_dim), jnp.float32)
    p["beta"] = jnp.zeros((1, bottleneck_dim), jnp.float32)
    p["rmean"] = jnp.zeros((1, bottleneck_dim), jnp.float32)
    p["rvar"] = jnp.ones((1, bottleneck_dim), jnp.float32)
    # classifier_layer: both Linear weights ~ N(0, 0.01), biases = 0
    p["wc1"] = 0.01 * jax.random.normal(k[1], (bottleneck_dim, width), jnp.float32)
    p["bc1"] = jnp.zeros((1, width), jnp.float32)
    p["wc2"] = 0.01 * jax.random.normal(jax.random.fold_in(k[1], 1), (width, class_num), jnp.float32)
    p["bc2"] = jnp.zeros((1, class_num), jnp.float32)
    # classifier_layer_2: same init scheme
    p["wa1"] = 0.01 * jax.random.normal(k[2], (bottleneck_dim, width), jnp.float32)
    p["ba1"] = jnp.zeros((1, width), jnp.float32)
    p["wa2"] = 0.01 * jax.random.normal(jax.random.fold_in(k[2], 1), (width, class_num), jnp.float32)
    p["ba2"] = jnp.zeros((1, class_num), jnp.float32)
    return p


def reference_forward(fmap_nhwc, params):
    """Pure-JAX f32 reference of the eval-mode forward (sanity check)."""
    x = jnp.maximum(fmap_nhwc, 0.0)
    pooled = jnp.mean(x, axis=(1, 2))                       # (B, C)
    z = pooled @ params["wb"] + params["bb"]
    inv_std = jax.lax.rsqrt(params["rvar"] + BN_EPS)
    z = (z - params["rmean"]) * inv_std * params["gamma"] + params["beta"]
    feats = jnp.maximum(z, 0.0)
    h = jnp.maximum(feats @ params["wc1"] + params["bc1"], 0.0)
    logits = h @ params["wc2"] + params["bc2"]
    smax = jax.nn.softmax(logits, axis=1)
    ha = jnp.maximum(feats @ params["wa1"] + params["ba1"], 0.0)
    adv = ha @ params["wa2"] + params["ba2"]
    return feats, logits, smax, adv


if __name__ == "__main__":
    # Small shapes: batch=16 (exercises the batch grid, tb=8 -> 2 grid steps),
    # backbone channels(width)=128, spatial=4x4, bottleneck=128, class_num=31 (default).
    B, H, W, C = 16, 4, 4, 128
    WIDTH, BOTTLENECK, CLASS_NUM = C, 128, 31

    key = jax.random.PRNGKey(0)
    k_x, k_p = jax.random.split(key)
    # Stand-in backbone output, NHWC (XLA TPU conv-native layout), native f32 dtype.
    fmap = jax.random.normal(k_x, (B, H, W, C), jnp.float32)
    params = init_params(k_p, WIDTH, BOTTLENECK, CLASS_NUM)

    # One-time model-load-time parameter prep (BN fold, head fusion, class padding).
    prep = prepare_params(params, H * W)

    feats, outs, smax, outs_adv = mddnet_forward(fmap, prep)
    jax.block_until_ready((feats, outs, smax, outs_adv))

    assert feats.shape == (B, BOTTLENECK)
    assert outs.shape == (B, CLASS_NUM)
    assert smax.shape == (B, CLASS_NUM)
    assert outs_adv.shape == (B, CLASS_NUM)

    # Sanity check against the pure-JAX f32 reference (tolerance covers bf16 weights and
    # the approximate softmax reciprocal).
    rf, ro, rs, ra = reference_forward(fmap, params)
    assert bool(jnp.allclose(feats, rf, atol=2e-2)), "features mismatch"
    assert bool(jnp.allclose(outs, ro, atol=2e-2)), "logits mismatch"
    assert bool(jnp.allclose(smax, rs, atol=2e-2)), "softmax mismatch"
    assert bool(jnp.allclose(outs_adv, ra, atol=2e-2)), "adversarial logits mismatch"
    assert bool(jnp.all(jnp.isfinite(smax)))

    print("KERNEL_OK")
</pallas_src>

<mosaic_0001>
module attributes {stable_mosaic.version = 11 : i64} {
  func.func @mddnet_head_kernel(%arg0: i32, %arg1: memref<8x16x128xf32, #tpu.memory_space<vmem>>, %arg2: memref<128x128xbf16, #tpu.memory_space<vmem>>, %arg3: memref<1x128xf32, #tpu.memory_space<vmem>>, %arg4: memref<128x256xbf16, #tpu.memory_space<vmem>>, %arg5: memref<1x256xf32, #tpu.memory_space<vmem>>, %arg6: memref<256x256xbf16, #tpu.memory_space<vmem>>, %arg7: memref<1x256xf32, #tpu.memory_space<vmem>>, %arg8: memref<8x128xf32, #tpu.memory_space<vmem>>, %arg9: memref<8x128xf32, #tpu.memory_space<vmem>>, %arg10: memref<8x128xf32, #tpu.memory_space<vmem>>, %arg11: memref<8x128xf32, #tpu.memory_space<vmem>>) attributes {dimension_semantics = [#tpu.dimension_semantics<parallel>], iteration_bounds = array<i64: 2>, scalar_prefetch = 0 : i64, scratch_operands = 0 : i64, tpu.core_type = #tpu.core_type<tc>, window_params = [{transform_indices = @transform_0, window_bounds = array<i64: 8, 16, 128>}, {pipeline_mode = #tpu.pipeline_mode<synchronous>, transform_indices = @transform_1, window_bounds = array<i64: 128, 128>}, {pipeline_mode = #tpu.pipeline_mode<synchronous>, transform_indices = @transform_2, window_bounds = array<i64: 1, 128>}, {pipeline_mode = #tpu.pipeline_mode<synchronous>, transform_indices = @transform_3, window_bounds = array<i64: 128, 256>}, {pipeline_mode = #tpu.pipeline_mode<synchronous>, transform_indices = @transform_4, window_bounds = array<i64: 1, 256>}, {pipeline_mode = #tpu.pipeline_mode<synchronous>, transform_indices = @transform_5, window_bounds = array<i64: 256, 256>}, {pipeline_mode = #tpu.pipeline_mode<synchronous>, transform_indices = @transform_6, window_bounds = array<i64: 1, 256>}, {transform_indices = @transform_7, window_bounds = array<i64: 8, 128>}, {transform_indices = @transform_8, window_bounds = array<i64: 8, 128>}, {transform_indices = @transform_9, window_bounds = array<i64: 8, 128>}, {transform_indices = @transform_10, window_bounds = array<i64: 8, 128>}]} {
    %c0 = arith.constant 0 : index
    %c0_0 = arith.constant 0 : index
    %c0_1 = arith.constant 0 : index
    %0 = vector.load %arg1[%c0, %c0_0, %c0_1] : memref<8x16x128xf32, #tpu.memory_space<vmem>>, vector<8x16x128xf32>
    %cst = arith.constant 0.000000e+00 : f32
    %1 = vector.broadcast %cst : f32 to vector<8x16x128xf32>
    %2 = arith.maximumf %0, %1 : vector<8x16x128xf32>
    %cst_2 = arith.constant dense<0.000000e+00> : vector<8x128xf32>
    %3 = vector.multi_reduction <add>, %2, %cst_2 [1] : vector<8x16x128xf32> to vector<8x128xf32>
    %4 = arith.truncf %3 : vector<8x128xf32> to vector<8x128xbf16>
    %c0_3 = arith.constant 0 : index
    %c0_4 = arith.constant 0 : index
    %5 = vector.load %arg2[%c0_3, %c0_4] : memref<128x128xbf16, #tpu.memory_space<vmem>>, vector<128x128xbf16>
    %cst_5 = arith.constant dense<0.000000e+00> : vector<8x128xf32>
    %6 = tpu.matmul %4, %5, %cst_5 {dimension_numbers = #tpu.dot_dimension_numbers<[1], [0], [0], [1], [0, 0, 1, 1], [], []>} : vector<8x128xbf16>, vector<128x128xbf16>, vector<8x128xf32> -> vector<8x128xf32>
    %c0_6 = arith.constant 0 : index
    %c0_7 = arith.constant 0 : index
    %7 = vector.load %arg3[%c0_6, %c0_7] : memref<1x128xf32, #tpu.memory_space<vmem>>, vector<1x128xf32>
    %8 = vector.broadcast %7 : vector<1x128xf32> to vector<8x128xf32>
    %9 = arith.addf %6, %8 : vector<8x128xf32>
    %cst_8 = arith.constant 0.000000e+00 : f32
    %10 = vector.broadcast %cst_8 : f32 to vector<8x128xf32>
    %11 = arith.maximumf %9, %10 : vector<8x128xf32>
    %c0_9 = arith.constant 0 : index
    %c0_10 = arith.constant 0 : index
    %12 = vector.load %arg8[%c0_9, %c0_10] : memref<8x128xf32, #tpu.memory_space<vmem>>, vector<8x128xf32>
    tpu.vector_store %arg8[%c0_9, %c0_10], %11 {strides = array<i32>} : memref<8x128xf32, #tpu.memory_space<vmem>>, vector<8x128xf32>,
    %13 = arith.truncf %11 : vector<8x128xf32> to vector<8x128xbf16>
    %c0_11 = arith.constant 0 : index
    %c0_12 = arith.constant 0 : index
    %14 = vector.load %arg4[%c0_11, %c0_12] : memref<128x256xbf16, #tpu.memory_space<vmem>>, vector<128x256xbf16>
    %cst_13 = arith.constant dense<0.000000e+00> : vector<8x256xf32>
    %15 = tpu.matmul %13, %14, %cst_13 {dimension_numbers = #tpu.dot_dimension_numbers<[1], [0], [0], [1], [0, 0, 1, 1], [], []>} : vector<8x128xbf16>, vector<128x256xbf16>, vector<8x256xf32> -> vector<8x256xf32>
    %c0_14 = arith.constant 0 : index
    %c0_15 = arith.constant 0 : index
    %16 = vector.load %arg5[%c0_14, %c0_15] : memref<1x256xf32, #tpu.memory_space<vmem>>, vector<1x256xf32>
    %17 = vector.broadcast %16 : vector<1x256xf32> to vector<8x256xf32>
    %18 = arith.addf %15, %17 : vector<8x256xf32>
    %cst_16 = arith.constant 0.000000e+00 : f32
    %19 = vector.broadcast %cst_16 : f32 to vector<8x256xf32>
    %20 = arith.maximumf %18, %19 : vector<8x256xf32>
    %21 = arith.truncf %20 : vector<8x256xf32> to vector<8x256xbf16>
    %c0_17 = arith.constant 0 : index
    %c0_18 = arith.constant 0 : index
    %22 = vector.load %arg6[%c0_17, %c0_18] : memref<256x256xbf16, #tpu.memory_space<vmem>>, vector<256x256xbf16>
    %cst_19 = arith.constant dense<0.000000e+00> : vector<8x256xf32>
    %23 = tpu.matmul %21, %22, %cst_19 {dimension_numbers = #tpu.dot_dimension_numbers<[1], [0], [0], [1], [0, 0, 1, 1], [], []>} : vector<8x256xbf16>, vector<256x256xbf16>, vector<8x256xf32> -> vector<8x256xf32>
    %c0_20 = arith.constant 0 : index
    %c0_21 = arith.constant 0 : index
    %24 = vector.load %arg7[%c0_20, %c0_21] : memref<1x256xf32, #tpu.memory_space<vmem>>, vector<1x256xf32>
    %25 = vector.broadcast %24 : vector<1x256xf32> to vector<8x256xf32>
    %26 = arith.addf %23, %25 : vector<8x256xf32>
    %27 = vector.extract_strided_slice %26 {offsets = [0, 0], sizes = [8, 128], strides = [1, 1]} : vector<8x256xf32> to vector<8x128xf32>
    %28 = vector.extract_strided_slice %26 {offsets = [0, 128], sizes = [8, 128], strides = [1, 1]} : vector<8x256xf32> to vector<8x128xf32>
    %c0_22 = arith.constant 0 : index
    %c0_23 = arith.constant 0 : index
    %29 = vector.load %arg9[%c0_22, %c0_23] : memref<8x128xf32, #tpu.memory_space<vmem>>, vector<8x128xf32>
    tpu.vector_store %arg9[%c0_22, %c0_23], %27 {strides = array<i32>} : memref<8x128xf32, #tpu.memory_space<vmem>>, vector<8x128xf32>,
    %c0_24 = arith.constant 0 : index
    %c0_25 = arith.constant 0 : index
    %30 = vector.load %arg11[%c0_24, %c0_25] : memref<8x128xf32, #tpu.memory_space<vmem>>, vector<8x128xf32>
    tpu.vector_store %arg11[%c0_24, %c0_25], %28 {strides = array<i32>} : memref<8x128xf32, #tpu.memory_space<vmem>>, vector<8x128xf32>,
    %cst_26 = arith.constant dense<0xFF800000> : vector<8xf32>
    %31 = vector.multi_reduction <maximumf>, %27, %cst_26 [1] : vector<8x128xf32> to vector<8xf32>
    %32 = vector.shape_cast %31 : vector<8xf32> to vector<8x1xf32>
    %33 = vector.broadcast %32 : vector<8x1xf32> to vector<8x128xf32>
    %34 = arith.subf %27, %33 : vector<8x128xf32>
    %35 = math.exp %34 : vector<8x128xf32>
    %cst_27 = arith.constant dense<0.000000e+00> : vector<8xf32>
    %36 = vector.multi_reduction <add>, %35, %cst_27 [1] : vector<8x128xf32> to vector<8xf32>
    %37 = vector.shape_cast %36 : vector<8xf32> to vector<8x1xf32>
    %38 = tpu.reciprocal %37 {approx = true} : vector<8x1xf32> -> vector<8x1xf32>
    %39 = vector.broadcast %38 : vector<8x1xf32> to vector<8x128xf32>
    %40 = arith.mulf %35, %39 : vector<8x128xf32>
    %c0_28 = arith.constant 0 : index
    %c0_29 = arith.constant 0 : index
    %41 = vector.load %arg10[%c0_28, %c0_29] : memref<8x128xf32, #tpu.memory_space<vmem>>, vector<8x128xf32>
    tpu.vector_store %arg10[%c0_28, %c0_29], %40 {strides = array<i32>} : memref<8x128xf32, #tpu.memory_space<vmem>>, vector<8x128xf32>,
    return
  }
  func.func @transform_0(%arg0: i32) -> (i32, i32, i32) {
    %c0_i32 = arith.constant 0 : i32
    %c0_i32_0 = arith.constant 0 : i32
    %c0_i32_1 = arith.constant 0 : i32
    return %arg0, %c0_i32, %c0_i32_0 : i32, i32, i32
  }
  func.func @transform_1(%arg0: i32) -> (i32, i32) {
    %c0_i32 = arith.constant 0 : i32
    %c0_i32_0 = arith.constant 0 : i32
    %c0_i32_1 = arith.constant 0 : i32
    return %c0_i32, %c0_i32_0 : i32, i32
  }
  func.func @transform_2(%arg0: i32) -> (i32, i32) {
    %c0_i32 = arith.constant 0 : i32
    %c0_i32_0 = arith.constant 0 : i32
    %c0_i32_1 = arith.constant 0 : i32
    return %c0_i32, %c0_i32_0 : i32, i32
  }
  func.func @transform_3(%arg0: i32) -> (i32, i32) {
    %c0_i32 = arith.constant 0 : i32
    %c0_i32_0 = arith.constant 0 : i32
    %c0_i32_1 = arith.constant 0 : i32
    return %c0_i32, %c0_i32_0 : i32, i32
  }
  func.func @transform_4(%arg0: i32) -> (i32, i32) {
    %c0_i32 = arith.constant 0 : i32
    %c0_i32_0 = arith.constant 0 : i32
    %c0_i32_1 = arith.constant 0 : i32
    return %c0_i32, %c0_i32_0 : i32, i32
  }
  func.func @transform_5(%arg0: i32) -> (i32, i32) {
    %c0_i32 = arith.constant 0 : i32
    %c0_i32_0 = arith.constant 0 : i32
    %c0_i32_1 = arith.constant 0 : i32
    return %c0_i32, %c0_i32_0 : i32, i32
  }
  func.func @transform_6(%arg0: i32) -> (i32, i32) {
    %c0_i32 = arith.constant 0 : i32
    %c0_i32_0 = arith.constant 0 : i32
    %c0_i32_1 = arith.constant 0 : i32
    return %c0_i32, %c0_i32_0 : i32, i32
  }
  func.func @transform_7(%arg0: i32) -> (i32, i32) {
    %c0_i32 = arith.constant 0 : i32
    %c0_i32_0 = arith.constant 0 : i32
    return %arg0, %c0_i32 : i32, i32
  }
  func.func @transform_8(%arg0: i32) -> (i32, i32) {
    %c0_i32 = arith.constant 0 : i32
    %c0_i32_0 = arith.constant 0 : i32
    return %arg0, %c0_i32 : i32, i32
  }
  func.func @transform_9(%arg0: i32) -> (i32, i32) {
    %c0_i32 = arith.constant 0 : i32
    %c0_i32_0 = arith.constant 0 : i32
    return %arg0, %c0_i32 : i32, i32
  }
  func.func @transform_10(%arg0: i32) -> (i32, i32) {
    %c0_i32 = arith.constant 0 : i32
    %c0_i32_0 = arith.constant 0 : i32
    return %arg0, %c0_i32 : i32, i32
  }
}

</mosaic_0001>

<bundles_post_ra>
// kernel: tpu_custom_call.1
= control target key start
LH: loop header
LB: loop body
LE: loop exit
PB: predicated region body
PF: predicated region fallthrough
CT: control target
= control target key end

     0   :  { %s2419_s0 = inlined_call_operand.hbm [shape: f32[16,16,128], index: 0, kind: input, shape index: {}]   ;;  %s2420_s1 = inlined_call_operand.hbm [shape: bf16[128,128], index: 1, kind: input, shape index: {}]   ;;  %s2421_s2 = inlined_call_operand.vmem [shape: f32[1,128], index: 2, kind: input, shape index: {}]   ;;  %s2422_s3 = inlined_call_operand.hbm [shape: bf16[128,256], index: 3, kind: input, shape index: {}]   ;;  %s2423_s4 = inlined_call_operand.vmem [shape: f32[1,256], index: 4, kind: input, shape index: {}]   ;;  %s2424_s5 = inlined_call_operand.hbm [shape: bf16[256,256], index: 5, kind: input, shape index: {}]   ;;  %s2425_s6 = inlined_call_operand.vmem [shape: f32[1,256], index: 6, kind: input, shape index: {}]   ;;  %s2426_s7 = inlined_call_operand.hbm [shape: f32[16,128], index: 7, kind: output, shape index: {0}]   ;;  %s2427_s8 = inlined_call_operand.hbm [shape: f32[16,128], index: 8, kind: output, shape index: {1}]   ;;  %s2428_s9 = inlined_call_operand.hbm [shape: f32[16,128], index: 9, kind: output, shape index: {2}]   ;;  %s2429_s10 = inlined_call_operand.hbm [shape: f32[16,128], index: 10, kind: output, shape index: {3}]  }
   0x1   :  { %2438 = sst [smem:[#allocation24_spill]] %s2419_s0 }
   0x2   :  { %2439 = sst [smem:[#allocation25_spill]] %s2420_s1 }
   0x3   :  { %2440 = sst [smem:[#allocation26_spill]] %s2428_s9 }
   0x4   :  { %2441 = sst [smem:[#allocation27_spill]] %s2429_s10 }
   0x5   :  { %16 = vsyncpa [#allocation3], 0 }
   0x6   :  { %18 = vsyncpa [#allocation3 + $0x1], 0 }
   0x7   :  { %19 = vsyncpa [#allocation6], 0 }
   0x8   :  { %20 = vsyncpa [#allocation9], 0 }
   0x9   :  { %21 = vsyncpa [#allocation4], 0 }
   0xa   :  { %23 = vsyncpa [#allocation4 + $0x1], 0 }
   0xb   :  { %24 = vsyncpa [#allocation12], 0 }
   0xc   :  { %26 = vsyncpa [#allocation12 + $0x1], 0 }
   0xd   :  { %27 = vsyncpa [#allocation15], 0 }
   0xe   :  { %29 = vsyncpa [#allocation15 + $0x1], 0  ;;  %s2017_s13 = smov 0   ;;  %s2019_s14 = smov 0  }
   0xf   :  { %s2021_s15 = smov 0   ;;  %s2023_s16 = smov 0  }
  0x10 LB: > { %2442 = sst [smem:[#allocation22_spill]] %s1933_s13  ;;  %s2038_s17 = sadd.s32 4294967295, %s1945_s16   ;;  %s1945_s16 = sphi %s2023_s16, %s2470_s16   ;;  %s1941_s15 = sphi %s2021_s15, %s2469_s15   ;;  %s1937_s14 = sphi %s2019_s14, %s2468_s14   ;;  %s1933_s13 = sphi %s2017_s13, %s2467_s13  }
  0x11   : > { %s2431_s18 = sadd.s32 4294967294, %s1945_s16   ;;  %p55_p0 = scmp.ne.s32.totalorder %s1937_s14, %s1933_s13 }
  0x12   : > { %p2430_p1 = scmp.eq.s32.totalorder %s2038_s17, 0  ;;  %p211_p3 = scmp.eq.s32.totalorder %s2431_s18, 1 }
  0x13   : > { %p1366_p5 = scmp.ge.s32.totalorder %s1945_s16, 1  ;;  %p296_p7 = scmp.lt.s32.totalorder %s1945_s16, 3 }
  0x14   : > { %p2049_p4 = por %p2430_p1, %p55_p0  ;;  %p2054_p6 = por %p211_p3, %p55_p0 }
  0x15   : > { %p2059_p8 = pnand %p1366_p5, %p296_p7  ;;  %s1947_s22 = smov [#allocation5]  }
  0x16   : > { %s2443_s19 = scalar_select %p2049_p4, 1, 0 }
  0x17   : > { %s2444_s20 = scalar_select %p2054_p6, 1, 0 }
  0x18   : > { %s2446_s21 = scalar_select %p2059_p8, 1, 0 }
  0x19   : > { %2445 = sst [smem:[#allocation23_spill]] %s2444_s20  ;;  %s308_s23 = sshll.u32 %s1947_s22, 4  ;;  %s2063_s23 = int_to_ptr.vmem [resolvable:$true] %s308_s23 }
  0x1a   : > { %p1504_p9 = pneg %p2059_p8  ;;  %s1948_s25 = smov [#allocation7]  }
  0x1b   : > { %s324_s26 = sshll.u32 %s1948_s25, 4  ;;  %s2448_s1 = sld [smem:[#allocation25_spill]]  ;;  %s2074_s26 = int_to_ptr.vmem [resolvable:$true] %s324_s26 }
  0x1c   : > { %p2070_p11 = pnand %p1504_p9, %p2430_p1 }
  0x1e   : > { %p2084_p13 = pneg %p2070_p11 }
  0x21   : > { %s1665_s29 = scalar_lea.hbm %s2448_s1, 1024 }
  0x22   : > { %p1666_p12 = scmp.ne.s32.totalorder %s2448_s1, %s1665_s29  ;;  %p1672_p5 = scmp.lt.u32.totalorder %s1665_s29, %s2448_s1 }
  0x24   : > { %p1668_p0 = pnand %p2084_p13, %p1666_p12 }
  0x26   : > { %p1669_p3 = pneg %p1668_p0 }
  0x28   : > { %p1674_p7 = pnand %p1672_p5, %p1669_p3 }
  0x2a   : > { %1677 = shalt.err (!%p1674_p7)
}
  0x2b   : > { %s1678_s27 = scalar_lea.vmem %s2063_s23, 1024  ;;  %p1686_p2 = scmp.lt.s32.totalorder %s2063_s23, %s2063_s23 }
  0x2c   : > { %p1679_p9 = scmp.ne.s32.totalorder %s2063_s23, %s1678_s27  ;;  %p1687_p6 = scmp.lt.s32.totalorder %s1678_s27, %s1678_s27 }
  0x2e   : > { %p1681_p10 = pnand %p1679_p9, %p2084_p13  ;;  %p1688_p12 = por %p1687_p6, %p1686_p2 }
  0x30   : > { %p1682_p1 = pneg %p1681_p10 }
  0x32   : > { %p1689_p0 = pnand %p1688_p12, %p1682_p1 }
  0x34   : > { %1692 = shalt.err (!%p1689_p0)
}
  0x35   : > { %s1949_s28 = smov 64   ;;  %s1950_s29 = smov 4  }
  0x36   : > { %1507 = dma.hbm_to_vmem [thread:$0]  (!%p2070_p11), %s2448_s1, 1024, %s2063_s23, [#allocation6], %s1949_s28, %s1949_s28, %s1950_s29  }
  0x37   : > { %s1693_s18 = scalar_lea.hbm %s2422_s3, 2048 }
  0x38   : > { %p1694_p2 = scmp.ne.s32.totalorder %s2422_s3, %s1693_s18  ;;  %p1700_p10 = scmp.lt.u32.totalorder %s1693_s18, %s2422_s3 }
  0x3a   : > { %p1696_p1 = pnand %p1694_p2, %p2084_p13 }
  0x3c   : > { %p1697_p6 = pneg %p1696_p1 }
  0x3e   : > { %p1702_p3 = pnand %p1700_p10, %p1697_p6 }
  0x40   : > { %1705 = shalt.err (!%p1702_p3)
}
  0x41   : > { %s1706_s23 = scalar_lea.vmem %s2074_s26, 2048  ;;  %p1714_p12 = scmp.lt.s32.totalorder %s2074_s26, %s2074_s26 }
  0x42   : > { %p1707_p5 = scmp.ne.s32.totalorder %s2074_s26, %s1706_s23  ;;  %p1715_p0 = scmp.lt.s32.totalorder %s1706_s23, %s1706_s23 }
  0x44   : > { %p1709_p7 = pnand %p1707_p5, %p2084_p13  ;;  %p1716_p2 = por %p1715_p0, %p1714_p12 }
  0x46   : > { %p1710_p9 = pneg %p1709_p7 }
  0x48   : > { %p1717_p1 = pnand %p1716_p2, %p1710_p9 }
  0x4a   : > { %1720 = shalt.err (!%p1717_p1)
}
  0x4b   : > { %s1951_s13 = smov 128   ;;  %s1952_s9 = smov 8  }
  0x4c   : > { %1510 = dma.hbm_to_vmem [thread:$0]  (!%p2070_p11), %s2422_s3, 2048, %s2074_s26, [#allocation6], %s1951_s13, %s1951_s13, %s1952_s9  }
  0x4d   : > { %s1953_s28 = smov [#allocation8]   ;;  %s2132_s30 = sadd.s32 1, %s1945_s16  }
  0x4e   : > { %s340_s29 = sshll.u32 %s1953_s28, 4  ;;  %s1721_s25 = scalar_lea.hbm %s2424_s5, 4096  ;;  %s341_s29 = int_to_ptr.vmem [resolvable:$true] %s340_s29 }
  0x4f   : > { %p1722_p6 = scmp.ne.s32.totalorder %s2424_s5, %s1721_s25  ;;  %p1728_p5 = scmp.lt.u32.totalorder %s1721_s25, %s2424_s5 }
  0x51   : > { %p1724_p10 = pnand %p1722_p6, %p2084_p13 }
  0x53   : > { %p1725_p3 = pneg %p1724_p10 }
  0x55   : > { %p1730_p7 = pnand %p1728_p5, %p1725_p3 }
  0x57   : > { %1733 = shalt.err (!%p1730_p7)
}
  0x58   : > { %s1734_s26 = scalar_lea.vmem %s341_s29, 4096  ;;  %p1742_p2 = scmp.lt.s32.totalorder %s341_s29, %s341_s29 }
  0x59   : > { %p1735_p9 = scmp.ne.s32.totalorder %s341_s29, %s1734_s26  ;;  %p1743_p1 = scmp.lt.s32.totalorder %s1734_s26, %s1734_s26 }
  0x5b   : > { %p1737_p12 = pnand %p1735_p9, %p2084_p13  ;;  %p1744_p4 = por %p1743_p1, %p1742_p2 }
  0x5d   : > { %p1738_p0 = pneg %p1737_p12 }
  0x5f   : > { %p1745_p8 = pnand %p1744_p4, %p1738_p0 }
  0x61   : > { %1748 = shalt.err (!%p1745_p8)
}
  0x62   : > { %1513 = dma.hbm_to_vmem [thread:$0]  (!%p2070_p11), %s2424_s5, 4096, %s341_s29, [#allocation9], %s1951_s13, %s1951_s13, %s1952_s9  }
  0x63   : > { %s39_s12 = ssub.s32 %s1945_s16, %s2132_s30  ;;  %s42_s24 = sadd.s32 1, %s1941_s15 }
  0x64   : > { %p40_p4 = scmp.eq.s32.totalorder %s39_s12, 0  ;;  %p49_p8 = scmp.ne.s32.totalorder %s1941_s15, %s1937_s14 }
  0x65   : > { %p50_p13 = scmp.eq.s32.totalorder %s1945_s16, 0  ;;  %p1534_p6 = scmp.lt.s32.totalorder %s1945_s16, 2 }
  0x66   : > { %s2163_s18 = scalar_select %p40_p4, %s1941_s15, %s42_s24  }
  0x67   : > { %p51_p10 = por %p50_p13, %p49_p8  ;;  %p2450_p3 = scmp.eq.s32.totalorder %s2038_s17, 1 }
  0x68   : > { %s357_s28 = sand.u32 1, %s1941_s15   ;;  %s1452_s11 = sshll.u32 %s1945_s16, 11 }
  0x69   : > { %p2167_p5 = por %p2450_p3, %p49_p8  ;;  %s1371_s22 = sshll.u32 %s357_s28, 7 }
  0x6a   : > { %s2452_s0 = sld [smem:[#allocation24_spill]]  ;;  %s361_s23 = scalar_lea.vmem [#allocation2], %s1371_s22 }
  0x6b   : > { %s369_s26 = sshll.u32 %s361_s23, 4  ;;  %p2178_p11 = pnand %p1534_p6, %p51_p10  ;;  %s2182_s26 = int_to_ptr.vmem [resolvable:$true] %s369_s26 }
  0x6c   : > { %s2184_s10 = scalar_lea.sflag [#allocation3], %s357_s28 }
  0x6d   : > { %p1751_p9 = pneg %p2178_p11 }
  0x70   : > { %s2176_s29 = scalar_lea.hbm %s2452_s0, %s1452_s11  ;;  %s1754_s22 = scalar_lea.hbm %s2452_s0, 4096 }
  0x71   : > { %s1749_s12 = scalar_lea.hbm %s2176_s29, 2048  ;;  %p1755_p2 = scmp.lt.u32.totalorder %s2176_s29, %s2452_s0 }
  0x72   : > { %p1750_p7 = scmp.ne.s32.totalorder %s2176_s29, %s1749_s12  ;;  %p1756_p1 = scmp.lt.u32.totalorder %s1754_s22, %s1749_s12 }
  0x73   : > { %p1758_p8 = scmp.lt.u32.totalorder %s1749_s12, %s2176_s29 }
  0x74   : > { %p1752_p12 = pnand %p1751_p9, %p1750_p7  ;;  %p1757_p4 = por %p1756_p1, %p1755_p2 }
  0x76   : > { %p1753_p0 = pneg %p1752_p12  ;;  %p1759_p13 = por %p1758_p8, %p1757_p4 }
  0x78   : > { %p1760_p6 = pnand %p1759_p13, %p1753_p0 }
  0x7a   : > { %1763 = shalt.err (!%p1760_p6)
}
  0x7b   : > { %s1764_s28 = scalar_lea.vmem %s2182_s26, 2048  ;;  %s1954_s23 = smov [#allocation2]  }
  0x7c   : > { %p1765_p10 = scmp.ne.s32.totalorder %s2182_s26, %s1764_s28  ;;  %s1769_s24 = sshll.u32 %s1954_s23, 4  ;;  %s1770_s24 = int_to_ptr.vmem [resolvable:$false] %s1769_s24 }
  0x7d   : > { %s1771_s11 = scalar_lea.vmem %s1770_s24, 4096  ;;  %p1772_p12 = scmp.lt.s32.totalorder %s2182_s26, %s1770_s24 }
  0x7e   : > { %p1767_p3 = pnand %p1765_p10, %p1751_p9  ;;  %p1773_p2 = scmp.lt.s32.totalorder %s1771_s11, %s1764_s28 }
  0x80   : > { %p1768_p7 = pneg %p1767_p3  ;;  %p1774_p1 = por %p1773_p2, %p1772_p12 }
  0x82   : > { %p1775_p4 = pnand %p1774_p1, %p1768_p7 }
  0x84   : > { %1778 = shalt.err (!%p1775_p4)
}
  0x85   : > { %1517 = dma.hbm_to_vmem [thread:$0]  (!%p2178_p11), %s2176_s29, 2048, %s2182_s26, %s2184_s10, %s1951_s13, %s1951_s13, %s1952_s9  }
  0x86   : > { %p2454_p9 = scmp.ne.s32.totalorder %s2446_s21, 0 }
  0x87   : > { %s2218_s12 = sand.u32 (!%p2454_p9), 1, %s1937_s14   ;;  %p2455_p0 = scmp.ne.s32.totalorder (!%p2454_p9), %s2443_s19, 0 }
  0x88   : > { %381 = sbr.rel (%p2454_p9) target bundleno = 1163 (0x48b), region = 48  ;;  %s1376_s22 = sshll.u32 (!%p2454_p9), %s2218_s12, 7 }
  0x89   : > { %s384_s25 = scalar_lea.sflag (!%p2454_p9), [#allocation3], %s2218_s12  ;;  %s2222_s27 = scalar_lea.vmem (!%p2454_p9), [#allocation2], %s1376_s22 }
  0x8f   : > { %1908 = dma.done.wait (%p2455_p0), %s384_s25, 2048  }
  0x90   : > { %1910 = vsyncadd (%p2455_p0), %s384_s25, 4294965248  ;;  %p2456_p11 = scmp.eq.s32.totalorder %s2038_s17, 0 }
  0x92   : > { %1912 = dma.done.wait (%p2456_p11), [#allocation6], 3072   ;;  %p2457_p8 = pmov %p2456_p11 }
  0x94   : > { %1914 = vsyncadd (%p2457_p8), [#allocation6], 4294964224  ;;  %p2458_p13 = pmov %p2457_p8 }
  0x95   : > { %p2459_p6 = pmov %p2457_p8 }
  0x96   : > { %1916 = dma.done.wait (%p2458_p13), [#allocation9], 4096  }
  0x97   : > { %1918 = vsyncadd (%p2459_p6), [#allocation9], 4294963200  ;;  %v1955_v0 = vmov 0.0   ;;  %vm1956_vm0 = vmmov 0   ;;  %v1581_v1 = vld [vmem:[#allocation5] sm:$0xff]   ;;  %v1582_v2 = vld [vmem:[#allocation5 + $0x8] sm:$0xff]  }
  0x98   : > { %1462 = vmatprep.subr.bf16.mxu1 %v1955_v0  ;;  %1478 = vmatprep.mubr.msk.bf16.mxu1 %vm1956_vm0, %v1955_v0  ;;  %v1583_v3 = vld [vmem:[#allocation5 + $0x10] sm:$0xff]   ;;  %v1584_v4 = vld [vmem:[#allocation5 + $0x18] sm:$0xff]   ;;  %v453_v5 = vld [vmem:[%s2222_s27] sm:$0xff]  ;;  %vm588_vm1 = vcmask 1041409   ;;  %vm590_vm2 = vcmask 1042434   ;;  %vm592_vm3 = vcmask 1043459  }
  0x99   : > { %1463 = vmatpush3.bf16.msra.mxu1 %v1581_v1  ;;  %v454_v6 = vld [vmem:[%s2222_s27 + $0x8] sm:$0xff]  ;;  %v455_v7 = vld [vmem:[%s2222_s27 + $0x10] sm:$0xff]  ;;  %v456_v8 = vld [vmem:[%s2222_s27 + $0x18] sm:$0xff]  ;;  %v469_v11 = vmax.f32 %v453_v5, 0.0  ;;  %vm594_vm4 = vcmask 1044484   ;;  %vm596_vm5 = vcmask 1045509  }
  0x9a   : > { %1464 = vmatprep.subr.bf16.mxu1 %v1955_v0  ;;  %v457_v9 = vld [vmem:[%s2222_s27 + $0x20] sm:$0xff]  ;;  %v458_v10 = vld [vmem:[%s2222_s27 + $0x28] sm:$0xff]  ;;  %v470_v12 = vmax.f32 %v454_v6, 0.0  ;;  %v471_v13 = vmax.f32 %v455_v7, 0.0  ;;  %v459_v14 = vld [vmem:[%s2222_s27 + $0x30] sm:$0xff]  ;;  %v472_v17 = vmax.f32 %v456_v8, 0.0 }
  0x9b   : > { %v460_v15 = vld [vmem:[%s2222_s27 + $0x38] sm:$0xff]  ;;  %v461_v16 = vld [vmem:[%s2222_s27 + $0x40] sm:$0xff]  ;;  %v473_v18 = vmax.f32 %v457_v9, 0.0  ;;  %v474_v19 = vmax.f32 %v458_v10, 0.0  ;;  %v462_v20 = vld [vmem:[%s2222_s27 + $0x48] sm:$0xff]  ;;  %v475_v23 = vmax.f32 %v459_v14, 0.0 }
  0x9c   : > { %v463_v21 = vld [vmem:[%s2222_s27 + $0x50] sm:$0xff]  ;;  %v464_v22 = vld [vmem:[%s2222_s27 + $0x58] sm:$0xff]  ;;  %v476_v24 = vmax.f32 %v460_v15, 0.0  ;;  %v477_v25 = vmax.f32 %v461_v16, 0.0  ;;  %v485_v26 = vadd.f32 %v470_v12, %v469_v11  ;;  %v465_v27 = vld [vmem:[%s2222_s27 + $0x60] sm:$0xff]  ;;  %v478_v30 = vmax.f32 %v462_v20, 0.0 }
  0x9d   : > { %1465 = vmatpush3.bf16.msra.mxu1 %v1582_v2  ;;  %v466_v28 = vld [vmem:[%s2222_s27 + $0x68] sm:$0xff]  ;;  %v467_v29 = vld [vmem:[%s2222_s27 + $0x70] sm:$0xff]  ;;  %v479_v31 = vmax.f32 %v463_v21, 0.0  ;;  %v480_v32 = vmax.f32 %v464_v22, 0.0  ;;  %v492_v33 = vadd.f32 %v472_v17, %v471_v13  ;;  %v468_v34 = vld [vmem:[%s2222_s27 + $0x78] sm:$0xff]  ;;  %v481_v35 = vmax.f32 %v465_v27, 0.0 }
  0x9e   : > { %1466 = vmatprep.subr.bf16.mxu1 %v1955_v0  ;;  %v482_v36 = vmax.f32 %v466_v28, 0.0  ;;  %v483_v37 = vmax.f32 %v467_v29, 0.0  ;;  %v486_v38 = vrot.slane %v485_v26, 4  ;;  %v1585_v39 = vld [vmem:[#allocation5 + $0x20] sm:$0xff]   ;;  %v484_v40 = vmax.f32 %v468_v34, 0.0  ;;  %v1586_v56 = vld [vmem:[#allocation5 + $0x28] sm:$0xff]  }
  0x9f   : > { %v493_v41 = vrot.slane %v492_v33, 4  ;;  %v499_v42 = vadd.f32 %v474_v19, %v473_v18  ;;  %v506_v43 = vadd.f32 %v476_v24, %v475_v23  ;;  %v513_v45 = vadd.f32 %v478_v30, %v477_v25  ;;  %v1587_v10 = vld [vmem:[#allocation5 + $0x30] sm:$0xff]   ;;  %v1588_v19 = vld [vmem:[#allocation5 + $0x38] sm:$0xff]   ;;  %v1591_v28 = vld [vmem:[#allocation7 + $0x4] ss:$8 sps:$4 sm:$0xff]   ;;  %s2267_s13 = sshll.u32 %s2218_s12, 3 }
  0xa0   : > { %v487_v44 = vadd.f32 %v486_v38, %v485_v26  ;;  %v520_v46 = vadd.f32 %v480_v32, %v479_v31  ;;  %v527_v47 = vadd.f32 %v482_v36, %v481_v35  ;;  %v534_v51 = vadd.f32 %v484_v40, %v483_v37  ;;  %s429_s9 = scalar_lea.vmem [#allocation10], %s2267_s13  ;;  %s436_s28 = scalar_lea.vmem [#allocation11], %s2267_s13 }
  0xa1   : > { %1467 = vmatpush3.bf16.msra.mxu1 %v1583_v3  ;;  %v494_v48 = vadd.f32 %v493_v41, %v492_v33  ;;  %v500_v49 = vrot.slane %v499_v42, 4  ;;  %v507_v50 = vrot.slane %v506_v43, 4  ;;  %v514_v53 = vrot.slane %v513_v45, 4  ;;  %s450_s23 = scalar_lea.vmem [#allocation14], %s2267_s13  ;;  %s1110_s24 = sand.u32 1, %s2038_s17  }
  0xa2   : > { %1468 = vmatprep.subr.bf16.mxu1 %v1955_v0  ;;  %v488_v52 = vrot.slane %v487_v44, 2  ;;  %v521_v54 = vrot.slane %v520_v46, 4  ;;  %v528_v55 = vrot.slane %v527_v47, 4  ;;  %v535_v60 = vrot.slane %v534_v51, 4  ;;  %s2287_s11 = sshll.u32 %s2038_s17, 7  ;;  %s1147_s19 = sshll.u32 %s436_s28, 4  ;;  %s2295_s19 = int_to_ptr.vmem [resolvable:$true] %s1147_s19 }
  0xa3   : > { %v495_v57 = vrot.slane %v494_v48, 2  ;;  %v501_v58 = vadd.f32 %v500_v49, %v499_v42  ;;  %v508_v59 = vadd.f32 %v507_v50, %v506_v43  ;;  %v515_v62 = vadd.f32 %v514_v53, %v513_v45  ;;  %s2293_s27 = scalar_lea.hbm %s2427_s8, %s2287_s11  ;;  %s2301_s26 = scalar_lea.hbm %s2426_s7, %s2287_s11 }
  0xa4   : > { %v489_v61 = vadd.f32 %v488_v52, %v487_v44  ;;  %v522_v63 = vadd.f32 %v521_v54, %v520_v46  ;;  %v529_v1 = vadd.f32 %v528_v55, %v527_v47  ;;  %v536_v5 = vadd.f32 %v535_v60, %v534_v51  ;;  %v1592_v60 = vld [vmem:[#allocation7 + $0x10] ss:$8 sps:$4 sm:$0xff]   ;;  %s2303_s17 = scalar_lea.sflag [#allocation12], %s1110_s24  ;;  %s1779_s1 = scalar_lea.vmem %s2295_s19, 128 }
  0xa5   : > { %1469 = vmatpush3.bf16.msra.mxu1 %v1584_v4  ;;  %v496_v2 = vadd.f32 %v495_v57, %v494_v48  ;;  %v502_v3 = vrot.slane %v501_v58, 2  ;;  %v509_v4 = vrot.slane %v508_v59, 2  ;;  %v516_v7 = vrot.slane %v515_v62, 2  ;;  %v1589_v57 = vld [vmem:[#allocation7] ss:$8 sps:$4 sm:$0xff]   ;;  %p1780_p10 = scmp.ne.s32.totalorder %s2295_s19, %s1779_s1  ;;  %s1958_s10 = smov [#allocation11]  }
  0xa6   : > { %1470 = vmatprep.subr.bf16.mxu1 %v1955_v0  ;;  %v490_v6 = vrot.slane %v489_v61, 1  ;;  %v523_v8 = vrot.slane %v522_v63, 2  ;;  %v530_v9 = vrot.slane %v529_v1, 2  ;;  %v537_v14 = vrot.slane %v536_v5, 2  ;;  %s1783_s22 = sshll.u32 %s1958_s10, 4  ;;  %s1784_s22 = int_to_ptr.vmem [resolvable:$false] %s1783_s22 }
  0xa7   : > { %v497_v11 = vrot.slane %v496_v2, 1  ;;  %v503_v12 = vadd.f32 %v502_v3, %v501_v58  ;;  %v510_v13 = vadd.f32 %v509_v4, %v508_v59  ;;  %v517_v16 = vadd.f32 %v516_v7, %v515_v62  ;;  %v1594_v59 = vld [vmem:[#allocation7 + $0x14] ss:$8 sps:$4 sm:$0xff]   ;;  %v1595_v62 = vld [vmem:[#allocation7 + $0x20] ss:$8 sps:$4 sm:$0xff]   ;;  %p1781_p3 = pnand %p1780_p10, %p2167_p5  ;;  %p1786_p12 = scmp.lt.s32.totalorder %s2295_s19, %s1784_s22 }
  0xa8   : > { %v491_v15 = vadd.f32 %v490_v6, %v489_v61  ;;  %v524_v17 = vadd.f32 %v523_v8, %v522_v63  ;;  %v531_v18 = vadd.f32 %v530_v9, %v529_v1  ;;  %v538_v23 = vadd.f32 %v537_v14, %v536_v5  ;;  %v1597_v61 = vld [vmem:[#allocation7 + $0x24] ss:$8 sps:$4 sm:$0xff]   ;;  %v1600_v63 = vld [vmem:[#allocation7 + $0x34] ss:$8 sps:$4 sm:$0xff]   ;;  %v1598_v1 = vld [vmem:[#allocation7 + $0x30] ss:$8 sps:$4 sm:$0xff]  }
  0xa9   : > { %1471 = vmatpush3.bf16.msra.mxu1 %v1585_v39  ;;  %v498_v20 = vadd.f32 %v497_v11, %v496_v2  ;;  %v504_v21 = vrot.slane %v503_v12, 1  ;;  %v511_v22 = vrot.slane %v510_v13, 1  ;;  %v518_v24 = vrot.slane %v517_v16, 1  ;;  %v1603_v2 = vld [vmem:[#allocation7 + $0x44] ss:$8 sps:$4 sm:$0xff]   ;;  %p1782_p7 = pneg %p1781_p3 }
  0xaa   : > { %1472 = vmatprep.subr.bf16.mxu1 %v1955_v0  ;;  %v525_v25 = vrot.slane %v524_v17, 1  ;;  %v532_v26 = vrot.slane %v531_v18, 1  ;;  %v541_v27 = vpack.c.bf16 %v491_v15, %v491_v15  ;;  %v539_v31 = vrot.slane %v538_v23, 1  ;;  %v1601_v3 = vld [vmem:[#allocation7 + $0x40] ss:$8 sps:$4 sm:$0xff]  }
  0xab   : > { %v505_v29 = vadd.f32 %v504_v21, %v503_v12  ;;  %v512_v30 = vadd.f32 %v511_v22, %v510_v13  ;;  %v542_v32 = vpack.c.bf16 %v498_v20, %v498_v20  ;;  %v519_v33 = vadd.f32 %v518_v24, %v517_v16  ;;  %v1606_v4 = vld [vmem:[#allocation7 + $0x54] ss:$8 sps:$4 sm:$0xff]   ;;  %v1604_v5 = vld [vmem:[#allocation7 + $0x50] ss:$8 sps:$4 sm:$0xff]   ;;  %v1609_v6 = vld [vmem:[#allocation7 + $0x64] ss:$8 sps:$4 sm:$0xff]  }
  0xac   : > { %v526_v34 = vadd.f32 %v525_v25, %v524_v17  ;;  %v533_v35 = vadd.f32 %v532_v26, %v531_v18  ;;  %v580_v36 = vunpack.c.l.b16 %v541_v27  ;;  %v540_v37 = vadd.f32 %v539_v31, %v538_v23  ;;  %v1607_v7 = vld [vmem:[#allocation7 + $0x60] ss:$8 sps:$4 sm:$0xff]   ;;  %v1612_v8 = vld [vmem:[#allocation7 + $0x74] ss:$8 sps:$4 sm:$0xff]   ;;  %v1610_v9 = vld [vmem:[#allocation7 + $0x70] ss:$8 sps:$4 sm:$0xff]  }
  0xad   : > { %1473 = vmatpush3.bf16.msra.mxu1 %v1586_v56  ;;  %v543_v38 = vpack.c.bf16 %v505_v29, %v505_v29  ;;  %v544_v39 = vpack.c.bf16 %v512_v30, %v512_v30  ;;  %v581_v40 = vunpack.c.l.b16 %v542_v32  ;;  %v545_v41 = vpack.c.bf16 %v519_v33, %v519_v33  ;;  %v1613_v11 = vld [vmem:[#allocation8 + $0x4] ss:$8 sps:$4 sm:$0xff]   ;;  %v1615_v12 = vld [vmem:[#allocation8] ss:$8 sps:$4 sm:$0xff]   ;;  %v1616_v13 = vld [vmem:[#allocation8 + $0x14] ss:$8 sps:$4 sm:$0xff]  }
  0xae   : > { %1474 = vmatprep.subr.bf16.mxu1 %v1955_v0  ;;  %v546_v42 = vpack.c.bf16 %v526_v34, %v526_v34  ;;  %v547_v43 = vpack.c.bf16 %v533_v35, %v533_v35  ;;  %v548_v44 = vpack.c.bf16 %v540_v37, %v540_v37  ;;  %vm598_vm6 = vcmask 1046534   ;;  %1052 = vmatprep.subr.bf16.mxu0 %v1613_v11  ;;  %v1618_v14 = vld [vmem:[#allocation8 + $0x10] ss:$8 sps:$4 sm:$0xff]   ;;  %v1619_v15 = vld [vmem:[#allocation8 + $0x24] ss:$8 sps:$4 sm:$0xff]  }
  0xaf   : > { %v582_v45 = vunpack.c.l.b16 %v543_v38  ;;  %v583_v46 = vunpack.c.l.b16 %v544_v39  ;;  %v589_v47 = vsel %vm588_vm1, %v581_v40, %v580_v36  ;;  %v584_v48 = vunpack.c.l.b16 %v545_v41  ;;  %1053 = vmatpush1.bf16.msra.mxu0 %v1615_v12  ;;  %v1621_v16 = vld [vmem:[#allocation8 + $0x20] ss:$8 sps:$4 sm:$0xff]   ;;  %v1622_v17 = vld [vmem:[#allocation8 + $0x34] ss:$8 sps:$4 sm:$0xff]   ;;  %v1624_v18 = vld [vmem:[#allocation8 + $0x30] ss:$8 sps:$4 sm:$0xff]  }
  0xb0   : > { %v586_v49 = vunpack.c.l.b16 %v547_v43  ;;  %v587_v51 = vunpack.c.l.b16 %v548_v44  ;;  %vm600_vm7 = vcmask 1047559   ;;  %1054 = vmatprep.subr.bf16.mxu0 %v1616_v13  ;;  %v1627_v20 = vld [vmem:[#allocation8 + $0x40] ss:$8 sps:$4 sm:$0xff]   ;;  %v1628_v21 = vld [vmem:[#allocation8 + $0x54] ss:$8 sps:$4 sm:$0xff]  }
  0xb1   : > { %1475 = vmatpush3.bf16.msra.mxu1 %v1587_v10  ;;  %v591_v50 = vsel %vm590_vm2, %v582_v45, %v589_v47  ;;  %v1957_v10 = vmov 0   ;;  %v1630_v22 = vld [vmem:[#allocation8 + $0x50] ss:$8 sps:$4 sm:$0xff]   ;;  %v1631_v23 = vld [vmem:[#allocation8 + $0x64] ss:$8 sps:$4 sm:$0xff]  }
  0xb2   : > { %1476 = vmatprep.subr.bf16.mxu1 %v1955_v0  ;;  %v585_v0 = vunpack.c.l.b16 %v546_v42  ;;  %v593_v52 = vsel %vm592_vm3, %v583_v46, %v591_v50  ;;  %v1633_v24 = vld [vmem:[#allocation8 + $0x60] ss:$8 sps:$4 sm:$0xff]   ;;  %v1634_v25 = vld [vmem:[#allocation8 + $0x74] ss:$8 sps:$4 sm:$0xff]   ;;  %v1636_v26 = vld [vmem:[#allocation8 + $0x70] ss:$8 sps:$4 sm:$0xff]   ;;  %v713_v50 = vlaneseq }
  0xb3   : > { %v595_v53 = vsel %vm594_vm4, %v584_v48, %v593_v52  ;;  %1055 = vmatpush1.bf16.msra.mxu0 %v1618_v14  ;;  %v1637_v27 = vld [vmem:[#allocation8 + $0x84] ss:$8 sps:$4 sm:$0xff]   ;;  %v1640_v29 = vld [vmem:[#allocation8 + $0x94] ss:$8 sps:$4 sm:$0xff]   ;;  %v1642_v30 = vld [vmem:[#allocation8 + $0x90] ss:$8 sps:$4 sm:$0xff]  }
  0xb4   : > { %v597_v54 = vsel %vm596_vm5, %v585_v0, %v595_v53  ;;  %1056 = vmatprep.subr.bf16.mxu0 %v1619_v15  ;;  %v1643_v31 = vld [vmem:[#allocation8 + $0xa4] ss:$8 sps:$4 sm:$0xff]   ;;  %v1645_v32 = vld [vmem:[#allocation8 + $0xa0] ss:$8 sps:$4 sm:$0xff]   ;;  %v1646_v33 = vld [vmem:[#allocation8 + $0xb4] ss:$8 sps:$4 sm:$0xff]  }
  0xb5   : > { %1477 = vmatpush3.bf16.msra.mxu1 %v1588_v19  ;;  %v599_v55 = vsel %vm598_vm6, %v586_v49, %v597_v54  ;;  %v1625_v19 = vld [vmem:[#allocation8 + $0x44] ss:$8 sps:$4 sm:$0xff]   ;;  %v1648_v34 = vld [vmem:[#allocation8 + $0xb0] ss:$8 sps:$4 sm:$0xff]   ;;  %v1651_v36 = vld [vmem:[#allocation8 + $0xc0] ss:$8 sps:$4 sm:$0xff]  }
  0xb6   : > { %803 = vmatprep.subr.bf16.mxu1 %v1591_v28  ;;  %v601_v56 = vsel %vm600_vm7, %v587_v51, %v599_v55  ;;  %v1639_v28 = vld [vmem:[#allocation8 + $0x80] ss:$8 sps:$4 sm:$0xff]   ;;  %v1649_v35 = vld [vmem:[#allocation8 + $0xc4] ss:$8 sps:$4 sm:$0xff]   ;;  %v1652_v37 = vld [vmem:[#allocation8 + $0xd4] ss:$8 sps:$4 sm:$0xff]  }
  0xb7   : > { %v602_v58 = vpack.c.b16 %v601_v56, %v601_v56  ;;  %1057 = vmatpush1.bf16.msra.mxu0 %v1621_v16  ;;  %v1654_v38 = vld [vmem:[#allocation8 + $0xd0] ss:$8 sps:$4 sm:$0xff]   ;;  %v1384_v39 = vld [vmem:[%s2421_s2] ss:$0 sm:$0xff]  ;;  %v1655_v47 = vld [vmem:[#allocation8 + $0xe4] ss:$8 sps:$4 sm:$0xff]  }
  0xb8   : > { %1058 = vmatprep.subr.bf16.mxu0 %v1622_v17  ;;  %v1657_v48 = vld [vmem:[#allocation8 + $0xe0] ss:$8 sps:$4 sm:$0xff]   ;;  %v1658_v0 = vld [vmem:[#allocation8 + $0xf4] ss:$8 sps:$4 sm:$0xff]   ;;  %v1660_v49 = vld [vmem:[#allocation8 + $0xf0] ss:$8 sps:$4 sm:$0xff]  }
  0xb9   : > { %1479 = vmatmul.mubr.bf16.vlgmr.msra.gmra.mrb[0].mxu1 %v602_v58  ;;  %v714_v51 = vshrl.u32 %v713_v50, 7  ;;  %v711_v53 = vld [vmem:[%s2423_s4] sm:$0x3] }
  0xba   : > { %804 = vmatpush1.bf16.msra.mxu1 %v1589_v57  ;;  %835 = vmatprep.mubr.bf16.mxu1 %v1957_v10 }
  0xbb   : > { %805 = vmatprep.subr.bf16.mxu1 %v1594_v59  ;;  %1059 = vmatpush1.bf16.msra.mxu0 %v1624_v18  ;;  %v715_v52 = vsub.s32 0, %v714_v51  ;;  %v719_v54 = vsub.s32 1, %v714_v51 }
  0xbc   : > { %1060 = vmatprep.subr.bf16.mxu0 %v1625_v19 }
  0xbd   : > { %v716_v55 = vrot.slane %v711_v53, %v715_v52  ;;  %v720_v56 = vrot.slane %v711_v53, %v719_v54 }
  0xbe   : > { %806 = vmatpush1.bf16.msra.mxu1 %v1592_v60 }
  0xbf   : > { %807 = vmatprep.subr.bf16.mxu1 %v1597_v61  ;;  %1061 = vmatpush1.bf16.msra.mxu0 %v1627_v20 }
  0xc0   : > { %1062 = vmatprep.subr.bf16.mxu0 %v1628_v21 }
  0xc2   : > { %808 = vmatpush1.bf16.msra.mxu1 %v1595_v62 }
  0xc3   : > { %809 = vmatprep.subr.bf16.mxu1 %v1600_v63  ;;  %1063 = vmatpush1.bf16.msra.mxu0 %v1630_v22 }
  0xc4   : > { %1064 = vmatprep.subr.bf16.mxu0 %v1631_v23 }
  0xc6   : > { %810 = vmatpush1.bf16.msra.mxu1 %v1598_v1 }
  0xc7   : > { %811 = vmatprep.subr.bf16.mxu1 %v1603_v2  ;;  %1065 = vmatpush1.bf16.msra.mxu0 %v1633_v24 }
  0xc8   : > { %1066 = vmatprep.subr.bf16.mxu0 %v1634_v25 }
  0xca   : > { %812 = vmatpush1.bf16.msra.mxu1 %v1601_v3 }
  0xcb   : > { %813 = vmatprep.subr.bf16.mxu1 %v1606_v4  ;;  %1067 = vmatpush1.bf16.msra.mxu0 %v1636_v26  ;;  %v880_v4 = vld [vmem:[%s2425_s6] sm:$0x3] }
  0xcc   : > { %1068 = vmatprep.subr.bf16.mxu0 %v1637_v27 }
  0xce   : > { %814 = vmatpush1.bf16.msra.mxu1 %v1604_v5  ;;  %v885_v5 = vrot.slane %v880_v4, %v715_v52 }
  0xcf   : > { %815 = vmatprep.subr.bf16.mxu1 %v1609_v6  ;;  %1069 = vmatpush1.bf16.msra.mxu0 %v1639_v28  ;;  %v889_v6 = vrot.slane %v880_v4, %v719_v54 }
  0xd0   : > { %1070 = vmatprep.subr.bf16.mxu0 %v1640_v29 }
  0xd2   : > { %816 = vmatpush1.bf16.msra.mxu1 %v1607_v7 }
  0xd3   : > { %817 = vmatprep.subr.bf16.mxu1 %v1612_v8  ;;  %1071 = vmatpush1.bf16.msra.mxu0 %v1642_v30 }
  0xd4   : > { %1072 = vmatprep.subr.bf16.mxu0 %v1643_v31 }
  0xd6   : > { %818 = vmatpush1.bf16.msra.mxu1 %v1610_v9 }
  0xd7   : > { %1073 = vmatpush1.bf16.msra.mxu0 %v1645_v32 }
  0xd8   : > { %1074 = vmatprep.subr.bf16.mxu0 %v1646_v33 }
  0xdb   : > { %1075 = vmatpush1.bf16.msra.mxu0 %v1648_v34 }
  0xdc   : > { %1076 = vmatprep.subr.bf16.mxu0 %v1649_v35 }
  0xdf   : > { %1077 = vmatpush1.bf16.msra.mxu0 %v1651_v36 }
  0xe0   : > { %1078 = vmatprep.subr.bf16.mxu0 %v1652_v37 }
  0xe3   : > { %1079 = vmatpush1.bf16.msra.mxu0 %v1654_v38 }
  0xe4   : > { %1080 = vmatprep.subr.bf16.mxu0 %v1655_v47 }
  0xe7   : > { %1081 = vmatpush1.bf16.msra.mxu0 %v1657_v48 }
  0xe8   : > { %1082 = vmatprep.subr.bf16.mxu0 %v1658_v0 }
  0xeb   : > { %1083 = vmatpush1.bf16.msra.mxu0 %v1660_v49 }
 0x18c   : > { %v686_v40 = vpop.f32.mrb[0].mxu1 }
 0x18d   : > { %v687_v41 = vadd.f32 %v1384_v39, %v686_v40  ;;  %v1480_v42 = vpop.f32.mrb[1].mxu1 }
 0x18e   : > { %v689_v43 = vpop.f32.mrb[2].mxu1 }
 0x18f   : > { %v692_v44 = vmax.f32 %v687_v41, 0.0  ;;  %v1481_v45 = vpop.f32.mrb[3].mxu1 }
 0x191   : > { %693 = vst [vmem:[%s429_s9] sm:$0xff] %v692_v44  ;;  %v694_v46 = vpack.c.bf16 %v692_v44, %v692_v44 }
 0x193   : > { %836 = vmatmul.mubr.bf16.vlgmr.msra.gmra.mrb[4].mxu1 %v694_v46 }
 0x266   : > { %v837_v57 = vpop.f32.mrb[4].mxu1 }
 0x267   : > { %v838_v58 = vadd.f32 %v837_v57, %v716_v55  ;;  %v839_v59 = vpop.f32.mrb[5].mxu1 }
 0x268   : > { %v840_v60 = vadd.f32 %v839_v59, %v720_v56  ;;  %v841_v61 = vpop.f32.mrb[6].mxu1 }
 0x269   : > { %v844_v62 = vmax.f32 %v838_v58, 0.0  ;;  %v842_v63 = vpop.f32.mrb[7].mxu1 }
 0x26a   : > { %v845_v1 = vmax.f32 %v840_v60, 0.0 }
 0x26b   : > { %v846_v3 = vpack.c.bf16 %v844_v62, %v844_v62 }
 0x26c   : > { %v847_v2 = vpack.c.bf16 %v845_v1, %v845_v1 }
 0x26e   : > { %1084 = vmatprep.mubr.bf16.mxu0 %v847_v2 }
 0x26f   : > { %1085 = vmatmul.mubr.bf16.vlgmr.msra.gmra.mrb[0].mxu0 %v846_v3 }
 0x342   : > { %v1086_v7 = vpop.f32.mrb[0].mxu0 }
 0x343   : > { %v1087_v8 = vadd.f32 %v1086_v7, %v885_v5  ;;  %v1088_v9 = vpop.f32.mrb[1].mxu0 }
 0x344   : > { %v1089_v10 = vadd.f32 %v1088_v9, %v889_v6  ;;  %v1090_v11 = vpop.f32.mrb[2].mxu0 }
 0x345   : > { %1093 = vst [vmem:[%s436_s28] sm:$0xff] %v1087_v8  ;;  %v1091_v12 = vpop.f32.mrb[3].mxu0  ;;  %1095 = vmax.xlane.f32.xlu0 %v1087_v8  ;;  %s1785_s28 = scalar_lea.vmem %s1784_s22, 256 }
 0x346   : > { %1094 = vst [vmem:[%s450_s23] sm:$0xff] %v1089_v10  ;;  %p1787_p2 = scmp.lt.s32.totalorder %s1785_s28, %s1779_s1 }
 0x348   : > { %p1788_p1 = por %p1787_p2, %p1786_p12 }
 0x34a   : > { %p1789_p4 = pnand %p1788_p1, %p1782_p7 }
 0x3d2   : > { %v1096_v13 = vpop.xlane.xlu0 %1095 }
 0x3d3   : > { %v1097_v14 = vsub.f32 %v1087_v8, %v1096_v13 }
 0x3d5   : > { %v1098_v15 = vmul.f32 1.442695, %v1097_v14 }
 0x3d7   : > { %1661 = vpow2.f32 %v1098_v15 }
 0x3e1   : > { %v2282_v16 = vpop.eup %1661 }
 0x3e2   : > { %1100 = vadd.xlane.f32.xlu0 %v2282_v16 }
 0x3e3   : > { %1792 = shalt.err (!%p1789_p4)
}
 0x3e4   : > { %s1793_s24 = scalar_lea.hbm %s2293_s27, 128  ;;  %s1797_s29 = scalar_lea.hbm %s2427_s8, 256 }
 0x3e5   : > { %p1794_p9 = scmp.ne.s32.totalorder %s2293_s27, %s1793_s24  ;;  %p1798_p8 = scmp.lt.u32.totalorder %s2293_s27, %s2427_s8 }
 0x3e6   : > { %p1799_p13 = scmp.lt.u32.totalorder %s1797_s29, %s1793_s24  ;;  %p1801_p10 = scmp.lt.u32.totalorder %s1793_s24, %s2293_s27 }
 0x3e7   : > { %p1795_p0 = pnand %p1794_p9, %p2167_p5 }
 0x3e8   : > { %p1800_p6 = por %p1799_p13, %p1798_p8 }
 0x3e9   : > { %p1796_p11 = pneg %p1795_p0 }
 0x3ea   : > { %p1802_p3 = por %p1801_p10, %p1800_p6 }
 0x3ec   : > { %p1803_p7 = pnand %p1802_p3, %p1796_p11 }
 0x3ee   : > { %1806 = shalt.err (!%p1803_p7)
}
 0x3ef   : > { %1497 = dma.vmem_to_hbm [thread:$0]  (%p2167_p5), %s2295_s19, 128, %s2293_s27, %s2303_s17  }
 0x3f0   : > { %s1134_s1 = sshll.u32 %s429_s9, 4  ;;  %s1106_s28 = scalar_lea.sflag [#allocation4], %s2218_s12  ;;  %s1135_s1 = int_to_ptr.vmem [resolvable:$true] %s1134_s1 }
 0x3f1   : > { %s1807_s25 = scalar_lea.vmem %s1135_s1, 128  ;;  %s1959_s24 = smov [#allocation10]  }
 0x3f2   : > { %p1808_p12 = scmp.ne.s32.totalorder %s1135_s1, %s1807_s25  ;;  %s1811_s21 = sshll.u32 %s1959_s24, 4  ;;  %s1812_s21 = int_to_ptr.vmem [resolvable:$false] %s1811_s21 }
 0x3f3   : > { %s1813_s29 = scalar_lea.vmem %s1812_s21, 256  ;;  %p1814_p4 = scmp.lt.s32.totalorder %s1135_s1, %s1812_s21 }
 0x3f4   : > { %p1809_p2 = pnand %p1808_p12, %p2167_p5  ;;  %p1815_p9 = scmp.lt.s32.totalorder %s1813_s29, %s1807_s25 }
 0x3f6   : > { %p1810_p1 = pneg %p1809_p2  ;;  %p1816_p0 = por %p1815_p9, %p1814_p4 }
 0x3f8   : > { %p1817_p11 = pnand %p1816_p0, %p1810_p1 }
 0x3fa   : > { %1820 = shalt.err (!%p1817_p11)
}
 0x3fb   : > { %s1821_s9 = scalar_lea.hbm %s2301_s26, 128  ;;  %s1825_s10 = scalar_lea.hbm %s2426_s7, 256 }
 0x3fc   : > { %p1822_p8 = scmp.ne.s32.totalorder %s2301_s26, %s1821_s9  ;;  %p1826_p10 = scmp.lt.u32.totalorder %s2301_s26, %s2426_s7 }
 0x3fd   : > { %p1827_p3 = scmp.lt.u32.totalorder %s1825_s10, %s1821_s9  ;;  %p1829_p12 = scmp.lt.u32.totalorder %s1821_s9, %s2301_s26 }
 0x3fe   : > { %p1823_p13 = pnand %p1822_p8, %p2167_p5 }
 0x3ff   : > { %p1828_p7 = por %p1827_p3, %p1826_p10 }
 0x400   : > { %p1824_p6 = pneg %p1823_p13 }
 0x401   : > { %p1830_p2 = por %p1829_p12, %p1828_p7 }
 0x403   : > { %p1831_p1 = pnand %p1830_p2, %p1824_p6 }
 0x405   : > { %1834 = shalt.err (!%p1831_p1)
}
 0x406   : > { %1496 = dma.vmem_to_hbm [thread:$0]  (%p2167_p5), %s1135_s1, 128, %s2301_s26, %s1106_s28  }
 0x407   : > { %s2460_s29 = sld [smem:[#allocation27_spill]]  ;;  %s1173_s19 = sshll.u32 %s450_s23, 4  ;;  %s1174_s19 = int_to_ptr.vmem [resolvable:$true] %s1173_s19 }
 0x408   : > { %s1121_s9 = scalar_lea.sflag [#allocation15], %s2218_s12  ;;  %s1835_s10 = scalar_lea.vmem %s1174_s19, 128 }
 0x409   : > { %p1836_p4 = scmp.ne.s32.totalorder %s1174_s19, %s1835_s10  ;;  %s1960_s22 = smov [#allocation14]  }
 0x40a   : > { %s1839_s24 = sshll.u32 %s1960_s22, 4  ;;  %s1840_s24 = int_to_ptr.vmem [resolvable:$false] %s1839_s24 }
 0x40b   : > { %p1837_p9 = pnand %p1836_p4, %p2167_p5  ;;  %s1841_s0 = scalar_lea.vmem %s1840_s24, 256 }
 0x40c   : > { %p1842_p11 = scmp.lt.s32.totalorder %s1174_s19, %s1840_s24  ;;  %p1843_p8 = scmp.lt.s32.totalorder %s1841_s0, %s1835_s10 }
 0x40d   : > { %s2351_s27 = scalar_lea.hbm %s2460_s29, %s2287_s11  ;;  %p1838_p0 = pneg %p1837_p9 }
 0x40e   : > { %p1844_p13 = por %p1843_p8, %p1842_p11 }
 0x410   : > { %p1845_p6 = pnand %p1844_p13, %p1838_p0 }
 0x412   : > { %1848 = shalt.err (!%p1845_p6)
}
 0x413   : > { %s1849_s12 = scalar_lea.hbm %s2351_s27, 128  ;;  %s1853_s1 = scalar_lea.hbm %s2460_s29, 256 }
 0x414   : > { %p1850_p10 = scmp.ne.s32.totalorder %s2351_s27, %s1849_s12  ;;  %p1854_p12 = scmp.lt.u32.totalorder %s2351_s27, %s2460_s29 }
 0x415   : > { %p1855_p2 = scmp.lt.u32.totalorder %s1853_s1, %s1849_s12  ;;  %p1857_p4 = scmp.lt.u32.totalorder %s1849_s12, %s2351_s27 }
 0x416   : > { %p1851_p3 = pnand %p1850_p10, %p2167_p5 }
 0x417   : > { %p1856_p1 = por %p1855_p2, %p1854_p12 }
 0x418   : > { %p1852_p7 = pneg %p1851_p3 }
 0x419   : > { %p1858_p9 = por %p1857_p4, %p1856_p1 }
 0x41b   : > { %p1859_p0 = pnand %p1858_p9, %p1852_p7 }
 0x41d   : > { %1862 = shalt.err (!%p1859_p0)
}
 0x41e   : > { %1499 = dma.vmem_to_hbm [thread:$0]  (%p2167_p5), %s1174_s19, 128, %s2351_s27, %s1121_s9  }
 0x41f   : > { %s443_s0 = scalar_lea.vmem [#allocation13], %s2267_s13  ;;  %s2461_s24 = sld [smem:[#allocation26_spill]] }
 0x420   : > { %s1160_s21 = sshll.u32 %s443_s0, 4  ;;  %s1961_s27 = smov [#allocation13]   ;;  %s1161_s21 = int_to_ptr.vmem [resolvable:$true] %s1160_s21 }
 0x421   : > { %s1863_s23 = scalar_lea.vmem %s1161_s21, 128  ;;  %s1867_s19 = sshll.u32 %s1961_s27, 4  ;;  %s1868_s19 = int_to_ptr.vmem [resolvable:$false] %s1867_s19 }
 0x422   : > { %p1864_p11 = scmp.ne.s32.totalorder %s1161_s21, %s1863_s23  ;;  %s1869_s13 = scalar_lea.vmem %s1868_s19, 256 }
 0x423   : > { %p1870_p6 = scmp.lt.s32.totalorder %s1161_s21, %s1868_s19  ;;  %p1871_p10 = scmp.lt.s32.totalorder %s1869_s13, %s1863_s23 }
 0x424   : > { %p1865_p8 = pnand %p1864_p11, %p2167_p5 }
 0x425   : > { %s2379_s12 = scalar_lea.hbm %s2461_s24, %s2287_s11  ;;  %p1872_p3 = por %p1871_p10, %p1870_p6 }
 0x426   : > { %p1866_p13 = pneg %p1865_p8 }
 0x428   : > { %p1873_p7 = pnand %p1872_p3, %p1866_p13 }
 0x46f   : > { %v1101_v17 = vpop.xlane.xlu0 %1100 }
 0x470   : > { %1663 = vrcp.f32 %v1101_v17 }
 0x47a   : > { %v1664_v18 = vpop.eup %1663 }
 0x47b   : > { %v1103_v19 = vmul.f32 %v1664_v18, %v2282_v16 }
 0x47d   : > { %1104 = vst [vmem:[%s443_s0] sm:$0xff] %v1103_v19 }
 0x47e   : > { %1876 = shalt.err (!%p1873_p7)
}
 0x47f   : > { %s1877_s11 = scalar_lea.hbm %s2379_s12, 128  ;;  %s1881_s1 = scalar_lea.hbm %s2461_s24, 256 }
 0x480   : > { %p1878_p12 = scmp.ne.s32.totalorder %s2379_s12, %s1877_s11  ;;  %p1882_p4 = scmp.lt.u32.totalorder %s2379_s12, %s2461_s24 }
 0x481   : > { %p1883_p9 = scmp.lt.u32.totalorder %s1881_s1, %s1877_s11  ;;  %p1885_p11 = scmp.lt.u32.totalorder %s1877_s11, %s2379_s12 }
 0x482   : > { %p1879_p2 = pnand %p1878_p12, %p2167_p5 }
 0x483   : > { %p1884_p0 = por %p1883_p9, %p1882_p4 }
 0x484   : > { %p1880_p1 = pneg %p1879_p2 }
 0x485   : > { %p1886_p8 = por %p1885_p11, %p1884_p0 }
 0x487   : > { %p1887_p13 = pnand %p1886_p8, %p1880_p1 }
 0x489   : > { %1890 = shalt.err (!%p1887_p13)
}
 0x48a   : > { %1498 = dma.vmem_to_hbm [thread:$0]  (%p2167_p5), %s1161_s21, 128, %s2379_s12, %s2303_s17  }
 0x48b PF: > { %s2462_s0 = sld [smem:[#allocation22_spill]]  ;;  %s2463_s10 = sld [smem:[#allocation23_spill]] }
 0x48c   : > { %p2465_p10 = scmp.ge.s32.totalorder %s1945_s16, 2 }
 0x491   : > { %s1185_s22 = sand.u32 1, %s2462_s0   ;;  %p2464_p6 = scmp.ne.s32.totalorder %s2463_s10, 0 }
 0x492   : > { %s1186_s23 = scalar_lea.sflag [#allocation4], %s1185_s22 }
 0x493   : > { %p1519_p3 = pnand %p2465_p10, %p2464_p6 }
 0x495   : > { %1920 = dma.done.wait (!%p1519_p3), %s1186_s23, 128  }
 0x496   : > { %1922 = vsyncadd (!%p1519_p3), %s1186_s23, 4294967168  ;;  %s2466_s27 = sadd.s32 4294967294, %s1945_s16  }
 0x497   : > { %s1194_s19 = sand.u32 1, %s2466_s27  }
 0x498   : > { %s1195_s13 = scalar_lea.sflag [#allocation12], %s1194_s19 }
 0x499   : > { %1924 = dma.done.wait (!%p1519_p3), %s1195_s13, 256  }
 0x49a   : > { %1926 = vsyncadd (!%p1519_p3), %s1195_s13, 4294967040  ;;  %s1213_s20 = scalar_lea.sflag [#allocation15], %s1185_s22 }
 0x49b   : > { %1928 = dma.done.wait (!%p1519_p3), %s1213_s20, 128  }
 0x49c   : > { %1930 = vsyncadd (!%p1519_p3), %s1213_s20, 4294967168  ;;  %p32_p5 = scmp.ge.s32.totalorder %s2132_s30, 4   ;;  %s2467_s13 = smov %s1937_s14 }
 0x49d   : > { %s2468_s14 = smov %s1941_s15  ;;  %s2469_s15 = smov %s2163_s18 }
 0x49e   : > { %s2470_s16 = smov %s2132_s30  ;;  %34 = sbr.rel (!%p32_p5) target bundleno = 16 (0x10), region = 154 }
 0x4a5   :  { %1218 = vsyncpa [#allocation3], 1 }
 0x4a6   :  { %1220 = vsyncpa [#allocation3 + $0x1], 1 }
 0x4a7   :  { %1221 = vsyncpa [#allocation6], 1 }
 0x4a8   :  { %1222 = vsyncpa [#allocation9], 1 }
 0x4a9   :  { %1223 = vsyncpa [#allocation4], 1 }
 0x4aa   :  { %1225 = vsyncpa [#allocation4 + $0x1], 1 }
 0x4ab   :  { %1226 = vsyncpa [#allocation12], 1 }
 0x4ac   :  { %1228 = vsyncpa [#allocation12 + $0x1], 1 }
 0x4ad   :  { %1229 = vsyncpa [#allocation15], 1 }
 0x4ae   :  { %1231 = vsyncpa [#allocation15 + $0x1], 1 }

</bundles_post_ra>
